<compile_context>
chip_gen: v7x
topology: tpu7x:2x2x1
jax: 0.10.0
libtpu: 0.0.40
codegen_flags: <defaults>
</compile_context>

<pallas_src>
import functools

import jax
import jax.numpy as jnp
from jax import lax
from jax.experimental import pallas as pl
from jax.experimental.pallas import tpu as pltpu


def _round_up(x, m):
    return ((x + m - 1) // m) * m


def _tpu_vmem_capacity_bytes():
    try:
        info = pltpu.get_tpu_info()
        cap = int(getattr(info, "vmem_capacity_bytes", 0))
        if cap > 0:
            return cap
    except Exception:
        pass
    return 128 * 1024 * 1024      # v5e / v6e default


# ---------------------------------------------------------------------------
# Pallas kernel: full GNN stack + pooling for bt packed blocks per grid step.
# ---------------------------------------------------------------------------
def _gnn_kernel(adj_ref, x_ref, w0_ref, wrest_ref, out_ref, *,
                num_layers: int, pooling_strategy: str,
                bt: int, g: int, np_pad: int, n_true: int,
                cin: int, cpad: int):
    npk = g * np_pad

    a_in = adj_ref[...]                                   # (bt, npk, npk)
    # Fused symmetric normalization: degree from the resident block
    # (XLU lane reduce, f32) + self loop, then D^-1/2 on the EUP.
    deg = jnp.sum(a_in.astype(jnp.float32), axis=-1, keepdims=True) + 1.0
    dinv = lax.rsqrt(deg)                                  # (bt, npk, 1) f32
    a_bf = a_in.astype(jnp.bfloat16)                       # MXU operand

    def aggregate(h):
        # A_norm @ H = dinv * (A @ (dinv*H) + dinv*H)      (self loop fused)
        hd = h * dinv                                                     # VPU f32
        agg = jnp.einsum('bnm,bmc->bnc', a_bf, hd.astype(jnp.bfloat16),
                         preferred_element_type=jnp.float32)              # MXU bf16
        return (agg + hd) * dinv                                          # VPU f32

    def transform(m, w_bf):
        # Fold (bt, npk) onto the sublane axis: one big matmul.  np_pad is a
        # multiple of 8, so the fold is a free view (no relayout copy).
        c = m.shape[-1]
        m2 = m.reshape(bt * npk, c).astype(jnp.bfloat16)
        o = jnp.dot(m2, w_bf, preferred_element_type=jnp.float32)         # MXU bf16
        return o.reshape(bt, npk, w_bf.shape[-1])

    h = x_ref[...].astype(jnp.float32)                     # (bt, npk, cin)

    # Layer 0: association chosen by MXU lane-group cost, not raw widths.
    if (cin + 127) // 128 <= cpad // 128:
        h = transform(aggregate(h), w0_ref[...])           # (A@H) @ W0
    else:
        h = aggregate(transform(h, w0_ref[...]))           # A @ (H@W0)
    h = jnp.maximum(h, 0.0)

    # Layers 1 .. num_layers-1 (static unroll; num_layers is small).
    for l in range(num_layers - 1):
        h = jnp.maximum(transform(aggregate(h), wrest_ref[l]), 0.0)

    # Per-graph pooling: unpack the block-diagonal packing, reduce over the
    # padded node axis.  Padded node rows are exactly zero (zero adjacency
    # cols + zero features), so max is unaffected (h >= 0 after ReLU) and the
    # mean divides by the TRUE node count.
    hp = h.reshape(bt, g, np_pad, cpad)
    if pooling_strategy == 'global_avg':
        pooled = jnp.sum(hp, axis=2) * (1.0 / n_true)      # (bt, g, cpad)
    elif pooling_strategy == 'global_max':
        pooled = jnp.max(hp, axis=2)
    else:
        # TODO(synk): last_avg / last_max need the per-graph last-node index
        # (PyG batch vector); the dense-batched layout does not carry it.
        raise NotImplementedError(pooling_strategy)

    out_ref[...] = pooled.astype(out_ref.dtype)            # lane-dense (bt,g,cpad)


# ---------------------------------------------------------------------------
# Wrapper: parameters, packing/padding, BlockSpecs, pallas_call.
# ---------------------------------------------------------------------------
class GNNFeatureExtractor:
    def __init__(self, in_channels, out_channels,
                 pooling_strategy='global_avg', num_layers=5, seed=0):
        if pooling_strategy not in ('global_avg', 'global_max',
                                    'last_avg', 'last_max'):
            raise ValueError(f'Invalid pooling strategy: {pooling_strategy}')
        self.in_channels = in_channels
        self.out_channels = out_channels
        self.pooling_strategy = pooling_strategy
        self.num_layers = num_layers
        self.cpad = _round_up(out_channels, 128)   # lane-dense output width

        # Deterministic synthetic weights (Glorot-ish), f32 masters.
        key = jax.random.PRNGKey(seed)
        k0, k1 = jax.random.split(key)
        s0 = (2.0 / (in_channels + out_channels)) ** 0.5
        s1 = (2.0 / (2 * out_channels)) ** 0.5
        self.w0 = jax.random.normal(k0, (in_channels, out_channels),
                                    jnp.float32) * s0
        self.w_rest = jax.random.normal(
            k1, (max(num_layers - 1, 1), out_channels, out_channels),
            jnp.float32) * s1

        # Zero-padded bf16 copies for the kernel; pad channels stay exactly 0.
        cpad = self.cpad
        self.w0_bf = (jnp.zeros((in_channels, cpad), jnp.bfloat16)
                      .at[:, :out_channels].set(self.w0.astype(jnp.bfloat16)))
        self.w_rest_bf = (jnp.zeros((max(num_layers - 1, 1), cpad, cpad),
                                    jnp.bfloat16)
                          .at[:, :out_channels, :out_channels]
                          .set(self.w_rest.astype(jnp.bfloat16)))

    def __call__(self, x, adj):
        """x: [B, N, Cin] float32; adj: [B, N, N] float32 raw 0/1 adjacency."""
        if self.pooling_strategy not in ('global_avg', 'global_max'):
            # TODO(synk): last_* pooling needs per-graph last-node indices.
            raise NotImplementedError(self.pooling_strategy)

        B, N, Cin = x.shape
        Cout, Cpad, L = self.out_channels, self.cpad, self.num_layers

        # ---- static tiling decisions ---------------------------------------
        Np = _round_up(N, 8)                      # sublane-aligned node count
        # Small-graph MXU fill: pack G graphs block-diagonally per matmul.
        G = max(1, min(128 // Np if Np <= 128 else 1, B))
        Npk = G * Np                              # packed nodes per block
        Bp0 = -(-B // G)                          # packed blocks (pre bt pad)

        vmem_cap = _tpu_vmem_capacity_bytes()
        # ~48 MiB usable on v7x (64 MiB part), ~112 MiB on v5e/v6e (128 MiB).
        vmem_limit = int(min(max(vmem_cap - 16 * 2**20, 32 * 2**20), 112 * 2**20))

        adj_elem = 2 if G > 1 else 4              # packed bf16, else raw f32
        w_bytes = (self.w0_bf.size + self.w_rest_bf.size) * 2  # single-buffered

        def step_bytes(c):
            adj_db = 2 * c * Npk * Npk * adj_elem      # adjacency double buffer
            a_bf16 = c * Npk * Npk * 2                 # in-kernel bf16 copy
            x_db = 2 * c * Npk * Cin * 2               # bf16 x double buffer
            out_db = 2 * c * G * Cpad * 4
            live = 4 * c * Npk * max(Cpad, Cin) * 4    # h/hd/agg/transform temps
            return adj_db + a_bf16 + x_db + out_db + live

        budget = int(0.75 * vmem_limit) - w_bytes
        bt = 1
        for cand in (16, 8, 4, 2, 1):
            if step_bytes(cand) <= budget:
                bt = cand
                break
        bt = max(1, min(bt, Bp0))
        # v7x has 2 TensorCores: prefer >= 2 grid steps over one fat step.
        if Bp0 >= 2:
            while bt > 1 and -(-Bp0 // bt) < 2:
                bt //= 2
        Bp = _round_up(Bp0, bt)                   # packed blocks = grid * bt
        Bpad = Bp * G                             # padded graph count
        grid = Bp // bt
        # TODO(synk): for very large N (adjacency block > VMEM even at bt=1),
        # add an inner node-row-tile pipeline (pltpu.emit_pipeline with the
        # adjacency in pl.ANY) keeping H resident in VMEM scratch across tiles.

        # ---- input prep (single fused pad/pack/cast passes) ----------------
        xq = (jnp.zeros((Bpad, Np, Cin), jnp.bfloat16)
              .at[:B, :N, :].set(x.astype(jnp.bfloat16)))
        xk = xq.reshape(Bp, Npk, Cin)

        if G > 1:
            # Packed adjacency is a new array anyway; materialize it directly
            # in bf16 (fewer HBM bytes) as block-diagonal (Bp, Npk, Npk).
            ap = (jnp.zeros((Bpad, Np, Np), jnp.bfloat16)
                  .at[:B, :N, :N].set(adj.astype(jnp.bfloat16)))
            ap = ap.reshape(Bp, G, Np, Np)
            eye_g = jnp.eye(G, dtype=jnp.bfloat16)
            adj_k = (ap[:, :, :, None, :] * eye_g[None, :, None, :, None]
                     ).reshape(Bp, Npk, Npk)
        elif (Np != N) or (Bpad != B):
            adj_k = (jnp.zeros((Bpad, Np, Np), adj.dtype)
                     .at[:B, :N, :N].set(adj))    # pad only, stay f32
        else:
            adj_k = adj                           # raw f32, cast to bf16 in VMEM

        kernel = functools.partial(
            _gnn_kernel, num_layers=L, pooling_strategy=self.pooling_strategy,
            bt=bt, g=G, np_pad=Np, n_true=N, cin=Cin, cpad=Cpad)

        flops = int(Bp * L * (2 * Npk * Npk * Cpad + 2 * Npk * Cpad * Cpad))
        bytes_accessed = int(adj_k.size * adj_k.dtype.itemsize
                             + xk.size * 2 + w_bytes + Bp * G * Cpad * 4)

        out = pl.pallas_call(
            kernel,
            out_shape=jax.ShapeDtypeStruct((Bp, G, Cpad), jnp.float32),
            grid_spec=pltpu.PrefetchScalarGridSpec(
                num_scalar_prefetch=0,
                grid=(grid,),
                in_specs=[
                    pl.BlockSpec((bt, Npk, Npk), lambda b: (b, 0, 0)),  # adjacency
                    pl.BlockSpec((bt, Npk, Cin), lambda b: (b, 0, 0)),  # x (bf16)
                    pl.BlockSpec((Cin, Cpad), lambda b: (0, 0),
                                 pipeline_mode=pl.Buffered(1)),         # W0
                    pl.BlockSpec((max(L - 1, 1), Cpad, Cpad),
                                 lambda b: (0, 0, 0),
                                 pipeline_mode=pl.Buffered(1)),         # W1..L-1
                ],
                out_specs=pl.BlockSpec((bt, G, Cpad), lambda b: (b, 0, 0)),
            ),
            compiler_params=pltpu.CompilerParams(
                dimension_semantics=("parallel",),
                vmem_limit_bytes=vmem_limit),
            cost_estimate=pl.CostEstimate(
                flops=flops, transcendentals=int(Bp * Npk),
                bytes_accessed=bytes_accessed),
        )(adj_k, xk, self.w0_bf, self.w_rest_bf)

        out = out.reshape(Bpad, Cpad)[:B, :Cout]
        return out

    # Pure-JAX reference mirroring the kernel's bf16 MXU operands / f32 accum.
    def reference(self, x, adj):
        B, N, Cin = x.shape
        deg = jnp.sum(adj, axis=-1, keepdims=True) + 1.0
        dinv = lax.rsqrt(deg)
        a_bf = adj.astype(jnp.bfloat16)

        def agg(h):
            hd = h * dinv
            s = jnp.einsum('bnm,bmc->bnc', a_bf, hd.astype(jnp.bfloat16),
                           preferred_element_type=jnp.float32)
            return (s + hd) * dinv

        def tr(m, w):
            return jnp.einsum('bnc,cd->bnd', m.astype(jnp.bfloat16),
                              w.astype(jnp.bfloat16),
                              preferred_element_type=jnp.float32)

        h = x.astype(jnp.bfloat16).astype(jnp.float32)   # mirror x quantization
        if (Cin + 127) // 128 <= self.cpad // 128:
            h = tr(agg(h), self.w0)
        else:
            h = agg(tr(h, self.w0))
        h = jnp.maximum(h, 0.0)
        for l in range(self.num_layers - 1):
            h = jnp.maximum(tr(agg(h), self.w_rest[l]), 0.0)
        if self.pooling_strategy == 'global_avg':
            return jnp.mean(h, axis=1)
        return jnp.max(h, axis=1)


if __name__ == "__main__":
    B, N, CIN, COUT, LAYERS = 2, 16, 4, 32, 5

    key = jax.random.PRNGKey(0)
    kx, ka = jax.random.split(key)
    x = jax.random.normal(kx, (B, N, CIN), jnp.float32)
    # Symmetric random 0/1 adjacency (no self loops; added in the fused kernel).
    a_rand = jax.random.uniform(ka, (B, N, N))
    adj = (a_rand + jnp.swapaxes(a_rand, 1, 2) > 1.0).astype(jnp.float32)
    adj = adj * (1.0 - jnp.eye(N, dtype=jnp.float32)[None])

    model = GNNFeatureExtractor(CIN, COUT, pooling_strategy='global_avg',
                                num_layers=LAYERS, seed=0)

    out = jax.block_until_ready(model(x, adj))
    ref = model.reference(x, adj)

    assert out.shape == (B, COUT)
    assert jnp.allclose(out, ref, atol=1e-2, rtol=1e-2), "mismatch vs reference"

    print("KERNEL_OK")
</pallas_src>

<mosaic_0001>
module attributes {stable_mosaic.version = 11 : i64} {
  func.func @_gnn_kernel(%arg0: i32, %arg1: memref<1x32x32xbf16, #tpu.memory_space<vmem>>, %arg2: memref<1x32x4xbf16, #tpu.memory_space<vmem>>, %arg3: memref<4x128xbf16, #tpu.memory_space<vmem>>, %arg4: memref<4x128x128xbf16, #tpu.memory_space<vmem>>, %arg5: memref<1x2x128xf32, #tpu.memory_space<vmem>>) attributes {dimension_semantics = [#tpu.dimension_semantics<parallel>], iteration_bounds = array<i64: 1>, scalar_prefetch = 0 : i64, scratch_operands = 0 : i64, tpu.core_type = #tpu.core_type<tc>, window_params = [{transform_indices = @transform_0, window_bounds = array<i64: 1, 32, 32>}, {transform_indices = @transform_1, window_bounds = array<i64: 1, 32, 4>}, {pipeline_mode = #tpu.pipeline_mode<synchronous>, transform_indices = @transform_2, window_bounds = array<i64: 4, 128>}, {pipeline_mode = #tpu.pipeline_mode<synchronous>, transform_indices = @transform_3, window_bounds = array<i64: 4, 128, 128>}, {transform_indices = @transform_4, window_bounds = array<i64: 1, 2, 128>}]} {
    %c0 = arith.constant 0 : index
    %c0_0 = arith.constant 0 : index
    %c0_1 = arith.constant 0 : index
    %0 = vector.load %arg1[%c0, %c0_0, %c0_1] : memref<1x32x32xbf16, #tpu.memory_space<vmem>>, vector<1x32x32xbf16>
    %1 = arith.extf %0 : vector<1x32x32xbf16> to vector<1x32x32xf32>
    %cst = arith.constant dense<0.000000e+00> : vector<1x32xf32>
    %2 = vector.multi_reduction <add>, %1, %cst [2] : vector<1x32x32xf32> to vector<1x32xf32>
    %3 = vector.shape_cast %2 : vector<1x32xf32> to vector<1x32x1xf32>
    %cst_2 = arith.constant 1.000000e+00 : f32
    %4 = vector.broadcast %cst_2 : f32 to vector<1x32x1xf32>
    %5 = arith.addf %3, %4 : vector<1x32x1xf32>
    %6 = math.rsqrt %5 : vector<1x32x1xf32>
    %c0_3 = arith.constant 0 : index
    %c0_4 = arith.constant 0 : index
    %c0_5 = arith.constant 0 : index
    %7 = vector.load %arg2[%c0_3, %c0_4, %c0_5] : memref<1x32x4xbf16, #tpu.memory_space<vmem>>, vector<1x32x4xbf16>
    %8 = arith.extf %7 : vector<1x32x4xbf16> to vector<1x32x4xf32>
    %9 = vector.broadcast %6 : vector<1x32x1xf32> to vector<1x32x4xf32>
    %10 = arith.mulf %8, %9 : vector<1x32x4xf32>
    %11 = arith.truncf %10 : vector<1x32x4xf32> to vector<1x32x4xbf16>
    "tpu.trace_start"() <{level = 10 : i32, message = "bnm,bmc->bnc"}> : () -> ()
    %cst_6 = arith.constant dense<0.000000e+00> : vector<1x32x4xf32>
    %12 = tpu.matmul %0, %11, %cst_6 {dimension_numbers = #tpu.dot_dimension_numbers<[2], [1], [1], [2], [0, 0, 0, 1, 1, 2], [0], [0]>} : vector<1x32x32xbf16>, vector<1x32x4xbf16>, vector<1x32x4xf32> -> vector<1x32x4xf32>
    "tpu.trace_stop"() : () -> ()
    %13 = arith.addf %12, %10 : vector<1x32x4xf32>
    %14 = vector.broadcast %6 : vector<1x32x1xf32> to vector<1x32x4xf32>
    %15 = arith.mulf %13, %14 : vector<1x32x4xf32>
    %c0_7 = arith.constant 0 : index
    %c0_8 = arith.constant 0 : index
    %16 = vector.load %arg3[%c0_7, %c0_8] : memref<4x128xbf16, #tpu.memory_space<vmem>>, vector<4x128xbf16>
    %17 = vector.shape_cast %15 : vector<1x32x4xf32> to vector<32x4xf32>
    %18 = arith.truncf %17 : vector<32x4xf32> to vector<32x4xbf16>
    %cst_9 = arith.constant dense<0.000000e+00> : vector<32x128xf32>
    %19 = tpu.matmul %18, %16, %cst_9 {dimension_numbers = #tpu.dot_dimension_numbers<[1], [0], [0], [1], [0, 0, 1, 1], [], []>} : vector<32x4xbf16>, vector<4x128xbf16>, vector<32x128xf32> -> vector<32x128xf32>
    %20 = vector.shape_cast %19 : vector<32x128xf32> to vector<1x32x128xf32>
    %cst_10 = arith.constant 0.000000e+00 : f32
    %21 = vector.broadcast %cst_10 : f32 to vector<1x32x128xf32>
    %22 = arith.maximumf %20, %21 : vector<1x32x128xf32>
    %23 = vector.broadcast %6 : vector<1x32x1xf32> to vector<1x32x128xf32>
    %24 = arith.mulf %22, %23 : vector<1x32x128xf32>
    %25 = arith.truncf %24 : vector<1x32x128xf32> to vector<1x32x128xbf16>
    "tpu.trace_start"() <{level = 10 : i32, message = "bnm,bmc->bnc"}> : () -> ()
    %cst_11 = arith.constant dense<0.000000e+00> : vector<1x32x128xf32>
    %26 = tpu.matmul %0, %25, %cst_11 {dimension_numbers = #tpu.dot_dimension_numbers<[2], [1], [1], [2], [0, 0, 0, 1, 1, 2], [0], [0]>} : vector<1x32x32xbf16>, vector<1x32x128xbf16>, vector<1x32x128xf32> -> vector<1x32x128xf32>
    "tpu.trace_stop"() : () -> ()
    %27 = arith.addf %26, %24 : vector<1x32x128xf32>
    %28 = vector.broadcast %6 : vector<1x32x1xf32> to vector<1x32x128xf32>
    %29 = arith.mulf %27, %28 : vector<1x32x128xf32>
    %c0_12 = arith.constant 0 : index
    %c0_13 = arith.constant 0 : index
    %c0_14 = arith.constant 0 : index
    %30 = vector.load %arg4[%c0_12, %c0_13, %c0_14] : memref<4x128x128xbf16, #tpu.memory_space<vmem>>, vector<1x128x128xbf16>
    %31 = vector.shape_cast %30 : vector<1x128x128xbf16> to vector<128x128xbf16>
    %32 = vector.shape_cast %29 : vector<1x32x128xf32> to vector<32x128xf32>
    %33 = arith.truncf %32 : vector<32x128xf32> to vector<32x128xbf16>
    %cst_15 = arith.constant dense<0.000000e+00> : vector<32x128xf32>
    %34 = tpu.matmul %33, %31, %cst_15 {dimension_numbers = #tpu.dot_dimension_numbers<[1], [0], [0], [1], [0, 0, 1, 1], [], []>} : vector<32x128xbf16>, vector<128x128xbf16>, vector<32x128xf32> -> vector<32x128xf32>
    %35 = vector.shape_cast %34 : vector<32x128xf32> to vector<1x32x128xf32>
    %cst_16 = arith.constant 0.000000e+00 : f32
    %36 = vector.broadcast %cst_16 : f32 to vector<1x32x128xf32>
    %37 = arith.maximumf %35, %36 : vector<1x32x128xf32>
    %38 = vector.broadcast %6 : vector<1x32x1xf32> to vector<1x32x128xf32>
    %39 = arith.mulf %37, %38 : vector<1x32x128xf32>
    %40 = arith.truncf %39 : vector<1x32x128xf32> to vector<1x32x128xbf16>
    "tpu.trace_start"() <{level = 10 : i32, message = "bnm,bmc->bnc"}> : () -> ()
    %cst_17 = arith.constant dense<0.000000e+00> : vector<1x32x128xf32>
    %41 = tpu.matmul %0, %40, %cst_17 {dimension_numbers = #tpu.dot_dimension_numbers<[2], [1], [1], [2], [0, 0, 0, 1, 1, 2], [0], [0]>} : vector<1x32x32xbf16>, vector<1x32x128xbf16>, vector<1x32x128xf32> -> vector<1x32x128xf32>
    "tpu.trace_stop"() : () -> ()
    %42 = arith.addf %41, %39 : vector<1x32x128xf32>
    %43 = vector.broadcast %6 : vector<1x32x1xf32> to vector<1x32x128xf32>
    %44 = arith.mulf %42, %43 : vector<1x32x128xf32>
    %c1 = arith.constant 1 : index
    %c0_18 = arith.constant 0 : index
    %c0_19 = arith.constant 0 : index
    %45 = vector.load %arg4[%c1, %c0_18, %c0_19] : memref<4x128x128xbf16, #tpu.memory_space<vmem>>, vector<1x128x128xbf16>
    %46 = vector.shape_cast %45 : vector<1x128x128xbf16> to vector<128x128xbf16>
    %47 = vector.shape_cast %44 : vector<1x32x128xf32> to vector<32x128xf32>
    %48 = arith.truncf %47 : vector<32x128xf32> to vector<32x128xbf16>
    %cst_20 = arith.constant dense<0.000000e+00> : vector<32x128xf32>
    %49 = tpu.matmul %48, %46, %cst_20 {dimension_numbers = #tpu.dot_dimension_numbers<[1], [0], [0], [1], [0, 0, 1, 1], [], []>} : vector<32x128xbf16>, vector<128x128xbf16>, vector<32x128xf32> -> vector<32x128xf32>
    %50 = vector.shape_cast %49 : vector<32x128xf32> to vector<1x32x128xf32>
    %cst_21 = arith.constant 0.000000e+00 : f32
    %51 = vector.broadcast %cst_21 : f32 to vector<1x32x128xf32>
    %52 = arith.maximumf %50, %51 : vector<1x32x128xf32>
    %53 = vector.broadcast %6 : vector<1x32x1xf32> to vector<1x32x128xf32>
    %54 = arith.mulf %52, %53 : vector<1x32x128xf32>
    %55 = arith.truncf %54 : vector<1x32x128xf32> to vector<1x32x128xbf16>
    "tpu.trace_start"() <{level = 10 : i32, message = "bnm,bmc->bnc"}> : () -> ()
    %cst_22 = arith.constant dense<0.000000e+00> : vector<1x32x128xf32>
    %56 = tpu.matmul %0, %55, %cst_22 {dimension_numbers = #tpu.dot_dimension_numbers<[2], [1], [1], [2], [0, 0, 0, 1, 1, 2], [0], [0]>} : vector<1x32x32xbf16>, vector<1x32x128xbf16>, vector<1x32x128xf32> -> vector<1x32x128xf32>
    "tpu.trace_stop"() : () -> ()
    %57 = arith.addf %56, %54 : vector<1x32x128xf32>
    %58 = vector.broadcast %6 : vector<1x32x1xf32> to vector<1x32x128xf32>
    %59 = arith.mulf %57, %58 : vector<1x32x128xf32>
    %c2 = arith.constant 2 : index
    %c0_23 = arith.constant 0 : index
    %c0_24 = arith.constant 0 : index
    %60 = vector.load %arg4[%c2, %c0_23, %c0_24] : memref<4x128x128xbf16, #tpu.memory_space<vmem>>, vector<1x128x128xbf16>
    %61 = vector.shape_cast %60 : vector<1x128x128xbf16> to vector<128x128xbf16>
    %62 = vector.shape_cast %59 : vector<1x32x128xf32> to vector<32x128xf32>
    %63 = arith.truncf %62 : vector<32x128xf32> to vector<32x128xbf16>
    %cst_25 = arith.constant dense<0.000000e+00> : vector<32x128xf32>
    %64 = tpu.matmul %63, %61, %cst_25 {dimension_numbers = #tpu.dot_dimension_numbers<[1], [0], [0], [1], [0, 0, 1, 1], [], []>} : vector<32x128xbf16>, vector<128x128xbf16>, vector<32x128xf32> -> vector<32x128xf32>
    %65 = vector.shape_cast %64 : vector<32x128xf32> to vector<1x32x128xf32>
    %cst_26 = arith.constant 0.000000e+00 : f32
    %66 = vector.broadcast %cst_26 : f32 to vector<1x32x128xf32>
    %67 = arith.maximumf %65, %66 : vector<1x32x128xf32>
    %68 = vector.broadcast %6 : vector<1x32x1xf32> to vector<1x32x128xf32>
    %69 = arith.mulf %67, %68 : vector<1x32x128xf32>
    %70 = arith.truncf %69 : vector<1x32x128xf32> to vector<1x32x128xbf16>
    "tpu.trace_start"() <{level = 10 : i32, message = "bnm,bmc->bnc"}> : () -> ()
    %cst_27 = arith.constant dense<0.000000e+00> : vector<1x32x128xf32>
    %71 = tpu.matmul %0, %70, %cst_27 {dimension_numbers = #tpu.dot_dimension_numbers<[2], [1], [1], [2], [0, 0, 0, 1, 1, 2], [0], [0]>} : vector<1x32x32xbf16>, vector<1x32x128xbf16>, vector<1x32x128xf32> -> vector<1x32x128xf32>
    "tpu.trace_stop"() : () -> ()
    %72 = arith.addf %71, %69 : vector<1x32x128xf32>
    %73 = vector.broadcast %6 : vector<1x32x1xf32> to vector<1x32x128xf32>
    %74 = arith.mulf %72, %73 : vector<1x32x128xf32>
    %c3 = arith.constant 3 : index
    %c0_28 = arith.constant 0 : index
    %c0_29 = arith.constant 0 : index
    %75 = vector.load %arg4[%c3, %c0_28, %c0_29] : memref<4x128x128xbf16, #tpu.memory_space<vmem>>, vector<1x128x128xbf16>
    %76 = vector.shape_cast %75 : vector<1x128x128xbf16> to vector<128x128xbf16>
    %77 = vector.shape_cast %74 : vector<1x32x128xf32> to vector<32x128xf32>
    %78 = arith.truncf %77 : vector<32x128xf32> to vector<32x128xbf16>
    %cst_30 = arith.constant dense<0.000000e+00> : vector<32x128xf32>
    %79 = tpu.matmul %78, %76, %cst_30 {dimension_numbers = #tpu.dot_dimension_numbers<[1], [0], [0], [1], [0, 0, 1, 1], [], []>} : vector<32x128xbf16>, vector<128x128xbf16>, vector<32x128xf32> -> vector<32x128xf32>
    %80 = vector.shape_cast %79 : vector<32x128xf32> to vector<1x32x128xf32>
    %cst_31 = arith.constant 0.000000e+00 : f32
    %81 = vector.broadcast %cst_31 : f32 to vector<1x32x128xf32>
    %82 = arith.maximumf %80, %81 : vector<1x32x128xf32>
    %83 = vector.shape_cast %82 : vector<1x32x128xf32> to vector<1x2x16x128xf32>
    %cst_32 = arith.constant dense<0.000000e+00> : vector<1x2x128xf32>
    %84 = vector.multi_reduction <add>, %83, %cst_32 [2] : vector<1x2x16x128xf32> to vector<1x2x128xf32>
    %cst_33 = arith.constant 6.250000e-02 : f32
    %85 = vector.broadcast %cst_33 : f32 to vector<1x2x128xf32>
    %86 = arith.mulf %84, %85 : vector<1x2x128xf32>
    %c0_34 = arith.constant 0 : index
    %c0_35 = arith.constant 0 : index
    %c0_36 = arith.constant 0 : index
    %87 = vector.load %arg5[%c0_34, %c0_35, %c0_36] : memref<1x2x128xf32, #tpu.memory_space<vmem>>, vector<1x2x128xf32>
    tpu.vector_store %arg5[%c0_34, %c0_35, %c0_36], %86 {strides = array<i32>} : memref<1x2x128xf32, #tpu.memory_space<vmem>>, vector<1x2x128xf32>,
    return
  }
  func.func @transform_0(%arg0: i32) -> (i32, i32, i32) {
    %c0_i32 = arith.constant 0 : i32
    %c0_i32_0 = arith.constant 0 : i32
    %c0_i32_1 = arith.constant 0 : i32
    return %arg0, %c0_i32, %c0_i32_0 : i32, i32, i32
  }
  func.func @transform_1(%arg0: i32) -> (i32, i32, i32) {
    %c0_i32 = arith.constant 0 : i32
    %c0_i32_0 = arith.constant 0 : i32
    %c0_i32_1 = arith.constant 0 : i32
    return %arg0, %c0_i32, %c0_i32_0 : i32, i32, i32
  }
  func.func @transform_2(%arg0: i32) -> (i32, i32) {
    %c0_i32 = arith.constant 0 : i32
    %c0_i32_0 = arith.constant 0 : i32
    %c0_i32_1 = arith.constant 0 : i32
    return %c0_i32, %c0_i32_0 : i32, i32
  }
  func.func @transform_3(%arg0: i32) -> (i32, i32, i32) {
    %c0_i32 = arith.constant 0 : i32
    %c0_i32_0 = arith.constant 0 : i32
    %c0_i32_1 = arith.constant 0 : i32
    %c0_i32_2 = arith.constant 0 : i32
    return %c0_i32, %c0_i32_0, %c0_i32_1 : i32, i32, i32
  }
  func.func @transform_4(%arg0: i32) -> (i32, i32, i32) {
    %c0_i32 = arith.constant 0 : i32
    %c0_i32_0 = arith.constant 0 : i32
    %c0_i32_1 = arith.constant 0 : i32
    return %arg0, %c0_i32, %c0_i32_0 : i32, i32, i32
  }
}

</mosaic_0001>

<bundles_post_ra>
// kernel: tpu_custom_call.1
= control target key start
LH: loop header
LB: loop body
LE: loop exit
PB: predicated region body
PF: predicated region fallthrough
CT: control target
= control target key end

     0   :  { %9 = vsyncpa [#allocation3], 0  ;;  %s1614_s0 = inlined_call_operand.hbm [shape: bf16[1,32,32], index: 0, kind: input, shape index: {}]   ;;  %s1615_s1 = inlined_call_operand.hbm [shape: bf16[1,32,4], index: 1, kind: input, shape index: {}]   ;;  %s1616_s2 = inlined_call_operand.hbm [shape: bf16[4,128], index: 2, kind: input, shape index: {}]   ;;  %s1617_s3 = inlined_call_operand.hbm [shape: bf16[4,128,128], index: 3, kind: input, shape index: {}]   ;;  %s1618_s4 = inlined_call_operand.hbm [shape: f32[1,2,128], index: 4, kind: output, shape index: {}]  }
   0x1   :  { %10 = vsyncpa [#allocation6], 0 }
   0x2   :  { %11 = vsyncpa [#allocation9], 0 }
   0x3   :  { %12 = vsyncpa [#allocation4], 0  ;;  %s1419_s15 = smov [#allocation5]   ;;  %s1420_s17 = smov [#allocation2]  }
   0x4   :  { %s30_s16 = sshll.u32 %s1419_s15, 4  ;;  %s18_s18 = sshll.u32 %s1420_s17, 4  ;;  %s31_s16 = int_to_ptr.vmem [resolvable:$true] %s30_s16  ;;  %s1451_s18 = int_to_ptr.vmem [resolvable:$true] %s18_s18 }
   0x5   :  { %s1301_s21 = scalar_lea.hbm %s1615_s1, 256 }
   0x6   :  { %p1302_p0 = scmp.ne.s32.totalorder %s1615_s1, %s1301_s21  ;;  %p1305_p1 = scmp.lt.u32.totalorder %s1301_s21, %s1615_s1 }
   0x8   :  { %p1307_p2 = pnand %p1305_p1, %p1302_p0 }
   0xa   :  { %1310 = shalt.err (!%p1307_p2)
}
   0xb   :  { %s1311_s26 = scalar_lea.vmem %s31_s16, 256  ;;  %p1316_p4 = scmp.lt.s32.totalorder %s31_s16, %s31_s16 }
   0xc   :  { %p1312_p3 = scmp.ne.s32.totalorder %s31_s16, %s1311_s26  ;;  %p1317_p5 = scmp.lt.s32.totalorder %s1311_s26, %s1311_s26 }
   0xe   :  { %p1318_p6 = por %p1317_p5, %p1316_p4 }
  0x10   :  { %p1319_p7 = pnand %p1318_p6, %p1312_p3 }
  0x12   :  { %1322 = shalt.err (!%p1319_p7)
}
  0x13   :  { %s1421_s27 = smov 64   ;;  %s1422_s28 = smov 4  }
  0x14   :  { %36 = dma.hbm_to_vmem [thread:$0]  %s1615_s1, 256, %s31_s16, [#allocation6], %s1421_s27, %s1421_s27, %s1422_s28  }
  0x15   :  { %s1323_s7 = scalar_lea.hbm %s1614_s0, 256 }
  0x16   :  { %p1324_p8 = scmp.ne.s32.totalorder %s1614_s0, %s1323_s7  ;;  %p1327_p9 = scmp.lt.u32.totalorder %s1323_s7, %s1614_s0 }
  0x18   :  { %p1329_p10 = pnand %p1327_p9, %p1324_p8 }
  0x1a   :  { %1332 = shalt.err (!%p1329_p10)
}
  0x1b   :  { %s1333_s12 = scalar_lea.vmem %s1451_s18, 256  ;;  %p1338_p12 = scmp.lt.s32.totalorder %s1451_s18, %s1451_s18 }
  0x1c   :  { %p1334_p11 = scmp.ne.s32.totalorder %s1451_s18, %s1333_s12  ;;  %p1339_p13 = scmp.lt.s32.totalorder %s1333_s12, %s1333_s12 }
  0x1e   :  { %p1340_p0 = por %p1339_p13, %p1338_p12 }
  0x20   :  { %p1341_p1 = pnand %p1340_p0, %p1334_p11 }
  0x22   :  { %1344 = shalt.err (!%p1341_p1)
}
  0x23   :  { %24 = dma.hbm_to_vmem [thread:$0]  %s1614_s0, 256, %s1451_s18, [#allocation3], %s1421_s27, %s1421_s27, %s1422_s28  }
  0x24   :  { %s1423_s14 = smov [#allocation7]   ;;  %s1424_s16 = smov [#allocation8]  }
  0x25   :  { %s43_s15 = sshll.u32 %s1423_s14, 4  ;;  %s52_s17 = sshll.u32 %s1424_s16, 4  ;;  %s44_s15 = int_to_ptr.vmem [resolvable:$true] %s43_s15  ;;  %s1488_s17 = int_to_ptr.vmem [resolvable:$true] %s52_s17 }
  0x26   :  { %s1345_s21 = scalar_lea.hbm %s1616_s2, 32 }
  0x27   :  { %p1346_p2 = scmp.ne.s32.totalorder %s1616_s2, %s1345_s21  ;;  %p1349_p3 = scmp.lt.u32.totalorder %s1345_s21, %s1616_s2 }
  0x29   :  { %p1351_p4 = pnand %p1349_p3, %p1346_p2 }
  0x2b   :  { %1354 = shalt.err (!%p1351_p4)
}
  0x2c   :  { %s1355_s0 = scalar_lea.vmem %s44_s15, 32  ;;  %p1360_p6 = scmp.lt.s32.totalorder %s44_s15, %s44_s15 }
  0x2d   :  { %p1356_p5 = scmp.ne.s32.totalorder %s44_s15, %s1355_s0  ;;  %p1361_p7 = scmp.lt.s32.totalorder %s1355_s0, %s1355_s0 }
  0x2f   :  { %p1362_p8 = por %p1361_p7, %p1360_p6 }
  0x31   :  { %p1363_p9 = pnand %p1362_p8, %p1356_p5 }
  0x33   :  { %1366 = shalt.err (!%p1363_p9)
}
  0x34   :  { %46 = dma.hbm_to_vmem [thread:$0]  %s1616_s2, 32, %s44_s15, [#allocation6]  }
  0x35   :  { %s1367_s5 = scalar_lea.hbm %s1617_s3, 4096 }
  0x36   :  { %p1368_p10 = scmp.ne.s32.totalorder %s1617_s3, %s1367_s5  ;;  %p1371_p11 = scmp.lt.u32.totalorder %s1367_s5, %s1617_s3 }
  0x38   :  { %p1373_p12 = pnand %p1371_p11, %p1368_p10 }
  0x3a   :  { %1376 = shalt.err (!%p1373_p12)
}
  0x3b   :  { %s1377_s10 = scalar_lea.vmem %s1488_s17, 4096  ;;  %p1382_p0 = scmp.lt.s32.totalorder %s1488_s17, %s1488_s17 }
  0x3c   :  { %p1378_p13 = scmp.ne.s32.totalorder %s1488_s17, %s1377_s10  ;;  %p1383_p1 = scmp.lt.s32.totalorder %s1377_s10, %s1377_s10 }
  0x3e   :  { %p1384_p2 = por %p1383_p1, %p1382_p0 }
  0x40   :  { %p1385_p3 = pnand %p1384_p2, %p1378_p13 }
  0x42   :  { %1388 = shalt.err (!%p1385_p3)
}
  0x43   :  { %58 = dma.hbm_to_vmem [thread:$0]  %s1617_s3, 4096, %s1488_s17, [#allocation9], %s1421_s27, %s1421_s27, %s1422_s28  }
  0x44   :  { %1411 = dma.done.wait [#allocation3], 256  }
  0x45   :  { %1412 = vsyncadd [#allocation3], 4294967040 }
  0x46   :  { %1413 = dma.done.wait [#allocation6], 288  }
  0x47   :  { %1414 = vsyncadd [#allocation6], 4294967008 }
  0x48   :  { %1415 = dma.done.wait [#allocation9], 4096  }
  0x49   :  { %1416 = vsyncadd [#allocation9], 4294963200  ;;  %v1522_v0 = vld [vmem:[#allocation2 + $0x8] sm:$0xff]   ;;  %vm80_vm0 = vcmask 261120   ;;  %v1524_v1 = vld [vmem:[#allocation2] sm:$0xff]   ;;  %vm194_vm1 = vcmask 1041408  }
  0x4a   :  { %v78_v2 = vunpack.c.l.bf16 %v1522_v0  ;;  %v76_v3 = vunpack.c.l.bf16 %v1524_v1  ;;  %v79_v4 = vunpack.c.h.bf16 %v1522_v0  ;;  %v77_v5 = vunpack.c.h.bf16 %v1524_v1  ;;  %1127 = vmatprep.mubr.msk.bf16.mxu0 %vm80_vm0, %v1524_v1  ;;  %1141 = vmatprep.mubr.msk.bf16.mxu1 %vm80_vm0, %v1524_v1  ;;  %v1052_v18 = vld [vmem:[#allocation5] sm:$0xff]   ;;  %v1059_v19 = vld [vmem:[#allocation5 + $0x8] sm:$0xff]   ;;  %v184_v34 = vld [vmem:[#allocation7] sm:$0x3]  ;;  %s1425_s3 = smov [#allocation10]  }
  0x4b   :  { %v1053_v21 = vunpack.c.l.bf16 %v1052_v18  ;;  %v1054_v22 = vunpack.c.h.bf16 %v1052_v18  ;;  %v1057_v23 = vunpack.c.l.bf16 %v1059_v19  ;;  %v1058_v24 = vunpack.c.h.bf16 %v1059_v19  ;;  %v1259_v50 = vld [vmem:[#allocation8] sm:$0xff]   ;;  %v1260_v51 = vld [vmem:[#allocation8 + $0x8] sm:$0xff]   ;;  %v1261_v52 = vld [vmem:[#allocation8 + $0x10] sm:$0xff]   ;;  %s994_s27 = sshll.u32 %s1425_s3, 4  ;;  %s995_s27 = int_to_ptr.vmem [resolvable:$true] %s994_s27 }
  0x4c   :  { %v87_v6 = vsel %vm80_vm0, %v78_v2, 0.0  ;;  %v81_v7 = vsel %vm80_vm0, %v76_v3, 0.0  ;;  %v90_v8 = vsel %vm80_vm0, %v79_v4, 0.0  ;;  %v84_v9 = vsel %vm80_vm0, %v77_v5, 0.0  ;;  %v1262_v53 = vld [vmem:[#allocation8 + $0x18] sm:$0xff]   ;;  %v1263_v54 = vld [vmem:[#allocation8 + $0x20] sm:$0xff]   ;;  %p1394_p5 = scmp.lt.s32.totalorder %s995_s27, %s995_s27 }
  0x4d   :  { %88 = vadd.xlane.f32.xlu1 %v87_v6  ;;  %82 = vadd.xlane.f32.xlu0 %v81_v7  ;;  %v196_v35 = vsel %vm194_vm1, %v184_v34, 0  ;;  %vm187_vm2 = vcmask 31744   ;;  %v1264_v55 = vld [vmem:[#allocation8 + $0x28] sm:$0xff]   ;;  %vm984_vm3 = vcmask 1041409   ;;  %s1389_s28 = scalar_lea.vmem %s995_s27, 32 }
  0x4e   :  { %p1390_p4 = scmp.ne.s32.totalorder %s995_s27, %s1389_s28  ;;  %p1395_p6 = scmp.lt.s32.totalorder %s1389_s28, %s1389_s28 }
  0x50   :  { %p1396_p7 = por %p1395_p6, %p1394_p5 }
  0x51   :  { %91 = vadd.xlane.f32.xlu1 %v90_v8  ;;  %85 = vadd.xlane.f32.xlu0 %v84_v9  ;;  %v1265_v8 = vld [vmem:[#allocation8 + $0x30] sm:$0xff]   ;;  %v1266_v9 = vld [vmem:[#allocation8 + $0x38] sm:$0xff]  }
  0x52   :  { %p1397_p8 = pnand %p1396_p7, %p1390_p4 }
  0xda   :  { %v89_v10 = vpop.xlane.xlu1 %88  ;;  %v83_v11 = vpop.xlane.xlu0 %82 }
  0xdb   :  { %v95_v12 = vadd.f32 1.0, %v89_v10  ;;  %v93_v13 = vadd.f32 1.0, %v83_v11 }
  0xdd   :  { %1293 = vrsqrt.f32 %v95_v12 }
  0xde   :  { %v92_v14 = vpop.xlane.xlu1 %91  ;;  %v86_v15 = vpop.xlane.xlu0 %85  ;;  %1295 = vrsqrt.f32 %v93_v13 }
  0xdf   :  { %v96_v16 = vadd.f32 1.0, %v92_v14  ;;  %v94_v17 = vadd.f32 1.0, %v86_v15 }
  0xe1   :  { %1297 = vrsqrt.f32 %v96_v16 }
  0xe2   :  { %1299 = vrsqrt.f32 %v94_v17 }
  0xe7   :  { %v1538_v20 = vpop.eup %1293 }
  0xe8   :  { %v1540_v25 = vpop.eup %1295  ;;  %v111_v30 = vmul.f32 %v1538_v20, %v1057_v23 }
  0xe9   :  { %v109_v28 = vmul.f32 %v1540_v25, %v1053_v21 }
  0xeb   :  { %v1542_v26 = vpop.eup %1297 }
  0xec   :  { %v1544_v27 = vpop.eup %1299  ;;  %v112_v31 = vmul.f32 %v1542_v26, %v1058_v24 }
  0xed   :  { %v110_v29 = vmul.f32 %v1544_v27, %v1054_v22 }
  0xee   :  { %v114_v33 = vpack.c.bf16 %v112_v31, %v111_v30 }
  0xef   :  { %v113_v32 = vpack.c.bf16 %v110_v29, %v109_v28 }
  0xf1   :  { %1123 = vmatprep.subr.bf16.mxu0 %v113_v32 }
  0xf2   :  { %1124 = vmatpush3.bf16.msra.mxu0 %v113_v32 }
  0xf3   :  { %1125 = vmatprep.subr.bf16.mxu0 %v114_v33 }
  0xf6   :  { %1126 = vmatpush3.bf16.msra.mxu0 %v114_v33 }
  0xf7   :  { %1249 = vmatprep.subr.msk.bf16.mxu0 %vm194_vm1, %v184_v34 }
  0xf9   :  { %1128 = vmatmul.mubr.msk.bf16.vlgmr.msra.gmra.mrb[0].mxu0 %vm80_vm0, %v1522_v0 }
  0xfa   :  { %1132 = vmatpush3.bf16.msra.mxu0 %v196_v35 }
  0xfb   :  { %1145 = vmatprep.subr.bf16.mxu0 %v1259_v50 }
 0x1cc   :  { %v1129_v36 = vpop.f32.mrb[0].mxu0 }
 0x1cd   :  { %v174_v37 = vadd.f32 %v1129_v36, %v111_v30  ;;  %v165_v38 = vpop.f32.mrb[1].mxu0 }
 0x1ce   :  { %v166_v39 = vadd.f32 %v165_v38, %v109_v28  ;;  %v1130_v40 = vpop.f32.mrb[2].mxu0 }
 0x1cf   :  { %v177_v41 = vadd.f32 %v1130_v40, %v112_v31  ;;  %v168_v42 = vpop.f32.mrb[3].mxu0  ;;  %v182_v44 = vmul.f32 %v1538_v20, %v174_v37 }
 0x1d0   :  { %v169_v43 = vadd.f32 %v168_v42, %v110_v29  ;;  %v180_v46 = vmul.f32 %v1540_v25, %v166_v39  ;;  %v1267_v42 = vld [vmem:[#allocation8 + $0x40] sm:$0xff]  }
 0x1d1   :  { %v183_v45 = vmul.f32 %v1542_v26, %v177_v41 }
 0x1d2   :  { %v181_v47 = vmul.f32 %v1544_v27, %v169_v43  ;;  %v1268_v43 = vld [vmem:[#allocation8 + $0x48] sm:$0xff]  }
 0x1d3   :  { %v186_v48 = vpack.c.bf16 %v183_v45, %v182_v44  ;;  %v1269_v44 = vld [vmem:[#allocation8 + $0x50] sm:$0xff]   ;;  %v1270_v45 = vld [vmem:[#allocation8 + $0x58] sm:$0xff]  }
 0x1d4   :  { %v185_v49 = vpack.c.bf16 %v181_v47, %v180_v46  ;;  %v1271_v46 = vld [vmem:[#allocation8 + $0x60] sm:$0xff]   ;;  %v1272_v47 = vld [vmem:[#allocation8 + $0x68] sm:$0xff]  }
 0x1d6   :  { %1133 = vmatprep.mubr.msk.bf16.mxu0 %vm187_vm2, %v185_v49  ;;  %v1274_v49 = vld [vmem:[#allocation8 + $0x78] sm:$0xff]  }
 0x1d7   :  { %1134 = vmatmul.mubr.msk.bf16.vlgmr.msra.gmra.mrb[4].mxu0 %vm187_vm2, %v186_v48  ;;  %v1273_v48 = vld [vmem:[#allocation8 + $0x70] sm:$0xff]  }
 0x1d8   :  { %1146 = vmatpush3.bf16.msra.mxu0 %v1259_v50 }
 0x1d9   :  { %1147 = vmatprep.subr.bf16.mxu0 %v1260_v51 }
 0x1dc   :  { %1148 = vmatpush3.bf16.msra.mxu0 %v1260_v51 }
 0x1dd   :  { %1149 = vmatprep.subr.bf16.mxu0 %v1261_v52 }
 0x1e0   :  { %1150 = vmatpush3.bf16.msra.mxu0 %v1261_v52 }
 0x1e1   :  { %1151 = vmatprep.subr.bf16.mxu0 %v1262_v53 }
 0x1e4   :  { %1152 = vmatpush3.bf16.msra.mxu0 %v1262_v53 }
 0x1e5   :  { %1153 = vmatprep.subr.bf16.mxu0 %v1263_v54 }
 0x1e8   :  { %1154 = vmatpush3.bf16.msra.mxu0 %v1263_v54 }
 0x1e9   :  { %1155 = vmatprep.subr.bf16.mxu0 %v1264_v55 }
 0x1ec   :  { %1156 = vmatpush3.bf16.msra.mxu0 %v1264_v55 }
 0x1ed   :  { %1157 = vmatprep.subr.bf16.mxu0 %v1265_v8 }
 0x1f0   :  { %1158 = vmatpush3.bf16.msra.mxu0 %v1265_v8 }
 0x1f1   :  { %1159 = vmatprep.subr.bf16.mxu0 %v1266_v9 }
 0x1f4   :  { %1160 = vmatpush3.bf16.msra.mxu0 %v1266_v9 }
 0x2aa   :  { %v1135_v56 = vpop.f32.mrb[4].mxu0 }
 0x2ab   :  { %v232_v57 = vpop.f32.mrb[5].mxu0  ;;  %v249_v62 = vmax.f32 %v1135_v56, 0.0 }
 0x2ac   :  { %v247_v58 = vmax.f32 %v232_v57, 0.0  ;;  %v1136_v59 = vpop.f32.mrb[6].mxu0 }
 0x2ad   :  { %v250_v60 = vmax.f32 %v1136_v59, 0.0  ;;  %v235_v61 = vpop.f32.mrb[7].mxu0  ;;  %v253_v5 = vmul.f32 %v1538_v20, %v249_v62 }
 0x2ae   :  { %v248_v63 = vmax.f32 %v235_v61, 0.0  ;;  %v251_v2 = vmul.f32 %v1540_v25, %v247_v58 }
 0x2af   :  { %v254_v3 = vmul.f32 %v1542_v26, %v250_v60 }
 0x2b0   :  { %v252_v4 = vmul.f32 %v1544_v27, %v248_v63 }
 0x2b1   :  { %v256_v7 = vpack.c.bf16 %v254_v3, %v253_v5 }
 0x2b2   :  { %v255_v6 = vpack.c.bf16 %v252_v4, %v251_v2 }
 0x2b4   :  { %1137 = vmatprep.subr.bf16.mxu1 %v255_v6 }
 0x2b5   :  { %1138 = vmatpush3.bf16.msra.mxu1 %v255_v6 }
 0x2b6   :  { %1139 = vmatprep.subr.bf16.mxu1 %v256_v7 }
 0x2b9   :  { %1140 = vmatpush3.bf16.msra.mxu1 %v256_v7 }
 0x2bc   :  { %1142 = vmatmul.mubr.msk.bf16.vlgmr.msra.gmra.mrb[0].mxu1 %vm80_vm0, %v1522_v0 }
 0x2bd   :  { %1169 = vmatprep.mubr.msk.bf16.mxu1 %vm80_vm0, %v1524_v1 }
 0x38f   :  { %v1143_v10 = vpop.f32.mrb[0].mxu1 }
 0x390   :  { %v300_v11 = vadd.f32 %v1143_v10, %v253_v5  ;;  %v291_v12 = vpop.f32.mrb[1].mxu1 }
 0x391   :  { %v292_v13 = vadd.f32 %v291_v12, %v251_v2  ;;  %v1144_v14 = vpop.f32.mrb[2].mxu1 }
 0x392   :  { %v303_v15 = vadd.f32 %v1144_v14, %v254_v3  ;;  %v294_v16 = vpop.f32.mrb[3].mxu1  ;;  %v308_v18 = vmul.f32 %v1538_v20, %v300_v11 }
 0x393   :  { %v295_v17 = vadd.f32 %v294_v16, %v252_v4  ;;  %v306_v21 = vmul.f32 %v1540_v25, %v292_v13  ;;  %v1276_v16 = vld [vmem:[#allocation8 + $0x88] sm:$0xff]  }
 0x394   :  { %v309_v19 = vmul.f32 %v1542_v26, %v303_v15 }
 0x395   :  { %v307_v22 = vmul.f32 %v1544_v27, %v295_v17  ;;  %v1277_v17 = vld [vmem:[#allocation8 + $0x90] sm:$0xff]  }
 0x396   :  { %v327_v23 = vpack.c.bf16 %v309_v19, %v308_v18  ;;  %v1278_v18 = vld [vmem:[#allocation8 + $0x98] sm:$0xff]   ;;  %v1279_v19 = vld [vmem:[#allocation8 + $0xa0] sm:$0xff]  }
 0x397   :  { %v326_v24 = vpack.c.bf16 %v307_v22, %v306_v21  ;;  %v1280_v21 = vld [vmem:[#allocation8 + $0xa8] sm:$0xff]   ;;  %v1281_v22 = vld [vmem:[#allocation8 + $0xb0] sm:$0xff]  }
 0x399   :  { %1161 = vmatprep.mubr.bf16.mxu0 %v326_v24 }
 0x39a   :  { %1162 = vmatmul.mubr.bf16.vlgmr.msra.gmra.mrb[8].mxu0 %v327_v23  ;;  %v1282_v23 = vld [vmem:[#allocation8 + $0xb8] sm:$0xff]  }
 0x39b   :  { %1197 = vmatprep.mubr.msk.bf16.mxu0 %vm80_vm0, %v1524_v1 }
 0x46d   :  { %v1163_v28 = vpop.f32.mrb[8].mxu0 }
 0x46e   :  { %v410_v29 = vpop.f32.mrb[9].mxu0  ;;  %v427_v34 = vmax.f32 %v1163_v28, 0.0 }
 0x46f   :  { %v425_v30 = vmax.f32 %v410_v29, 0.0  ;;  %v1164_v31 = vpop.f32.mrb[10].mxu0 }
 0x470   :  { %v428_v32 = vmax.f32 %v1164_v31, 0.0  ;;  %v413_v33 = vpop.f32.mrb[11].mxu0  ;;  %v431_v39 = vmul.f32 %v1538_v20, %v427_v34 }
 0x471   :  { %v426_v35 = vmax.f32 %v413_v33, 0.0  ;;  %v429_v36 = vmul.f32 %v1540_v25, %v425_v30 }
 0x472   :  { %v432_v37 = vmul.f32 %v1542_v26, %v428_v32 }
 0x473   :  { %v430_v38 = vmul.f32 %v1544_v27, %v426_v35 }
 0x474   :  { %v434_v41 = vpack.c.bf16 %v432_v37, %v431_v39 }
 0x475   :  { %v433_v40 = vpack.c.bf16 %v430_v38, %v429_v36 }
 0x477   :  { %1165 = vmatprep.subr.bf16.mxu1 %v433_v40 }
 0x478   :  { %1166 = vmatpush3.bf16.msra.mxu1 %v433_v40 }
 0x479   :  { %1167 = vmatprep.subr.bf16.mxu1 %v434_v41 }
 0x47c   :  { %1168 = vmatpush3.bf16.msra.mxu1 %v434_v41 }
 0x47d   :  { %1173 = vmatprep.subr.bf16.mxu1 %v1267_v42 }
 0x47f   :  { %1170 = vmatmul.mubr.msk.bf16.vlgmr.msra.gmra.mrb[4].mxu1 %vm80_vm0, %v1522_v0 }
 0x480   :  { %1174 = vmatpush3.bf16.msra.mxu1 %v1267_v42 }
 0x481   :  { %1175 = vmatprep.subr.bf16.mxu1 %v1268_v43 }
 0x484   :  { %1176 = vmatpush3.bf16.msra.mxu1 %v1268_v43 }
 0x485   :  { %1177 = vmatprep.subr.bf16.mxu1 %v1269_v44 }
 0x488   :  { %1178 = vmatpush3.bf16.msra.mxu1 %v1269_v44 }
 0x489   :  { %1179 = vmatprep.subr.bf16.mxu1 %v1270_v45 }
 0x48c   :  { %1180 = vmatpush3.bf16.msra.mxu1 %v1270_v45 }
 0x48d   :  { %1181 = vmatprep.subr.bf16.mxu1 %v1271_v46 }
 0x490   :  { %1182 = vmatpush3.bf16.msra.mxu1 %v1271_v46 }
 0x491   :  { %1183 = vmatprep.subr.bf16.mxu1 %v1272_v47 }
 0x494   :  { %1184 = vmatpush3.bf16.msra.mxu1 %v1272_v47 }
 0x495   :  { %1185 = vmatprep.subr.bf16.mxu1 %v1273_v48 }
 0x498   :  { %1186 = vmatpush3.bf16.msra.mxu1 %v1273_v48 }
 0x499   :  { %1187 = vmatprep.subr.bf16.mxu1 %v1274_v49 }
 0x49c   :  { %1188 = vmatpush3.bf16.msra.mxu1 %v1274_v49 }
 0x552   :  { %v1171_v50 = vpop.f32.mrb[4].mxu1 }
 0x553   :  { %v478_v51 = vadd.f32 %v1171_v50, %v431_v39  ;;  %v469_v52 = vpop.f32.mrb[5].mxu1 }
 0x554   :  { %v470_v53 = vadd.f32 %v469_v52, %v429_v36  ;;  %v1172_v54 = vpop.f32.mrb[6].mxu1 }
 0x555   :  { %v481_v55 = vadd.f32 %v1172_v54, %v432_v37  ;;  %v472_v56 = vpop.f32.mrb[7].mxu1  ;;  %v486_v58 = vmul.f32 %v1538_v20, %v478_v51 }
 0x556   :  { %v473_v57 = vadd.f32 %v472_v56, %v430_v38  ;;  %v484_v60 = vmul.f32 %v1540_v25, %v470_v53  ;;  %v1284_v56 = vld [vmem:[#allocation8 + $0xc8] sm:$0xff]  }
 0x557   :  { %v487_v59 = vmul.f32 %v1542_v26, %v481_v55  ;;  %v1283_v55 = vld [vmem:[#allocation8 + $0xc0] sm:$0xff]  }
 0x558   :  { %v485_v61 = vmul.f32 %v1544_v27, %v473_v57  ;;  %v1285_v57 = vld [vmem:[#allocation8 + $0xd0] sm:$0xff]  }
 0x559   :  { %v506_v62 = vpack.c.bf16 %v487_v59, %v486_v58  ;;  %v1286_v58 = vld [vmem:[#allocation8 + $0xd8] sm:$0xff]   ;;  %v1287_v59 = vld [vmem:[#allocation8 + $0xe0] sm:$0xff]  }
 0x55a   :  { %v505_v63 = vpack.c.bf16 %v485_v61, %v484_v60  ;;  %v1288_v60 = vld [vmem:[#allocation8 + $0xe8] sm:$0xff]   ;;  %v1289_v61 = vld [vmem:[#allocation8 + $0xf0] sm:$0xff]  }
 0x55c   :  { %1189 = vmatprep.mubr.bf16.mxu1 %v505_v63 }
 0x55d   :  { %1190 = vmatmul.mubr.bf16.vlgmr.msra.gmra.mrb[8].mxu1 %v506_v62  ;;  %v1290_v62 = vld [vmem:[#allocation8 + $0xf8] sm:$0xff]  }
 0x55e   :  { %1225 = vmatprep.mubr.msk.bf16.mxu1 %vm80_vm0, %v1524_v1  ;;  %v1275_v1 = vld [vmem:[#allocation8 + $0x80] sm:$0xff]  }
 0x630   :  { %v1191_v2 = vpop.f32.mrb[8].mxu1 }
 0x631   :  { %v589_v3 = vpop.f32.mrb[9].mxu1  ;;  %v606_v8 = vmax.f32 %v1191_v2, 0.0 }
 0x632   :  { %v604_v4 = vmax.f32 %v589_v3, 0.0  ;;  %v1192_v5 = vpop.f32.mrb[10].mxu1 }
 0x633   :  { %v607_v6 = vmax.f32 %v1192_v5, 0.0  ;;  %v592_v7 = vpop.f32.mrb[11].mxu1  ;;  %v610_v13 = vmul.f32 %v1538_v20, %v606_v8 }
 0x634   :  { %v605_v9 = vmax.f32 %v592_v7, 0.0  ;;  %v608_v10 = vmul.f32 %v1540_v25, %v604_v4 }
 0x635   :  { %v611_v11 = vmul.f32 %v1542_v26, %v607_v6 }
 0x636   :  { %v609_v12 = vmul.f32 %v1544_v27, %v605_v9 }
 0x637   :  { %v613_v15 = vpack.c.bf16 %v611_v11, %v610_v13 }
 0x638   :  { %v612_v14 = vpack.c.bf16 %v609_v12, %v608_v10 }
 0x63a   :  { %1193 = vmatprep.subr.bf16.mxu0 %v612_v14 }
 0x63b   :  { %1194 = vmatpush3.bf16.msra.mxu0 %v612_v14 }
 0x63c   :  { %1195 = vmatprep.subr.bf16.mxu0 %v613_v15 }
 0x63f   :  { %1196 = vmatpush3.bf16.msra.mxu0 %v613_v15 }
 0x640   :  { %1201 = vmatprep.subr.bf16.mxu0 %v1275_v1 }
 0x642   :  { %1198 = vmatmul.mubr.msk.bf16.vlgmr.msra.gmra.mrb[12].mxu0 %vm80_vm0, %v1522_v0 }
 0x643   :  { %1202 = vmatpush3.bf16.msra.mxu0 %v1275_v1 }
 0x644   :  { %1203 = vmatprep.subr.bf16.mxu0 %v1276_v16 }
 0x647   :  { %1204 = vmatpush3.bf16.msra.mxu0 %v1276_v16 }
 0x648   :  { %1205 = vmatprep.subr.bf16.mxu0 %v1277_v17 }
 0x64b   :  { %1206 = vmatpush3.bf16.msra.mxu0 %v1277_v17 }
 0x64c   :  { %1207 = vmatprep.subr.bf16.mxu0 %v1278_v18 }
 0x64f   :  { %1208 = vmatpush3.bf16.msra.mxu0 %v1278_v18 }
 0x650   :  { %1209 = vmatprep.subr.bf16.mxu0 %v1279_v19 }
 0x653   :  { %1210 = vmatpush3.bf16.msra.mxu0 %v1279_v19 }
 0x654   :  { %1211 = vmatprep.subr.bf16.mxu0 %v1280_v21 }
 0x657   :  { %1212 = vmatpush3.bf16.msra.mxu0 %v1280_v21 }
 0x658   :  { %1213 = vmatprep.subr.bf16.mxu0 %v1281_v22 }
 0x65b   :  { %1214 = vmatpush3.bf16.msra.mxu0 %v1281_v22 }
 0x65c   :  { %1215 = vmatprep.subr.bf16.mxu0 %v1282_v23 }
 0x65f   :  { %1216 = vmatpush3.bf16.msra.mxu0 %v1282_v23 }
 0x715   :  { %v1199_v24 = vpop.f32.mrb[12].mxu0 }
 0x716   :  { %v657_v28 = vadd.f32 %v1199_v24, %v610_v13  ;;  %v648_v29 = vpop.f32.mrb[13].mxu0 }
 0x717   :  { %v649_v30 = vadd.f32 %v648_v29, %v608_v10  ;;  %v1200_v31 = vpop.f32.mrb[14].mxu0 }
 0x718   :  { %v660_v32 = vadd.f32 %v1200_v31, %v611_v11  ;;  %v651_v33 = vpop.f32.mrb[15].mxu0  ;;  %v665_v35 = vmul.f32 %v1538_v20, %v657_v28 }
 0x719   :  { %v652_v34 = vadd.f32 %v651_v33, %v609_v12  ;;  %v663_v37 = vmul.f32 %v1540_v25, %v649_v30 }
 0x71a   :  { %v666_v36 = vmul.f32 %v1542_v26, %v660_v32 }
 0x71b   :  { %v664_v38 = vmul.f32 %v1544_v27, %v652_v34 }
 0x71c   :  { %v685_v39 = vpack.c.bf16 %v666_v36, %v665_v35 }
 0x71d   :  { %v684_v40 = vpack.c.bf16 %v664_v38, %v663_v37 }
 0x71f   :  { %1217 = vmatprep.mubr.bf16.mxu0 %v684_v40 }
 0x720   :  { %1218 = vmatmul.mubr.bf16.vlgmr.msra.gmra.mrb[16].mxu0 %v685_v39 }
 0x7f3   :  { %v1219_v41 = vpop.f32.mrb[16].mxu0 }
 0x7f4   :  { %v768_v42 = vpop.f32.mrb[17].mxu0  ;;  %v785_v47 = vmax.f32 %v1219_v41, 0.0 }
 0x7f5   :  { %v783_v43 = vmax.f32 %v768_v42, 0.0  ;;  %v1220_v44 = vpop.f32.mrb[18].mxu0 }
 0x7f6   :  { %v786_v45 = vmax.f32 %v1220_v44, 0.0  ;;  %v771_v46 = vpop.f32.mrb[19].mxu0  ;;  %v789_v52 = vmul.f32 %v1538_v20, %v785_v47 }
 0x7f7   :  { %v784_v48 = vmax.f32 %v771_v46, 0.0  ;;  %v787_v49 = vmul.f32 %v1540_v25, %v783_v43 }
 0x7f8   :  { %v790_v50 = vmul.f32 %v1542_v26, %v786_v45 }
 0x7f9   :  { %v788_v51 = vmul.f32 %v1544_v27, %v784_v48 }
 0x7fa   :  { %v792_v54 = vpack.c.bf16 %v790_v50, %v789_v52 }
 0x7fb   :  { %v791_v53 = vpack.c.bf16 %v788_v51, %v787_v49 }
 0x7fd   :  { %1221 = vmatprep.subr.bf16.mxu1 %v791_v53 }
 0x7fe   :  { %1222 = vmatpush3.bf16.msra.mxu1 %v791_v53 }
 0x7ff   :  { %1223 = vmatprep.subr.bf16.mxu1 %v792_v54 }
 0x802   :  { %1224 = vmatpush3.bf16.msra.mxu1 %v792_v54 }
 0x803   :  { %1229 = vmatprep.subr.bf16.mxu1 %v1283_v55 }
 0x805   :  { %1226 = vmatmul.mubr.msk.bf16.vlgmr.msra.gmra.mrb[12].mxu1 %vm80_vm0, %v1522_v0 }
 0x806   :  { %1230 = vmatpush3.bf16.msra.mxu1 %v1283_v55 }
 0x807   :  { %1231 = vmatprep.subr.bf16.mxu1 %v1284_v56 }
 0x80a   :  { %1232 = vmatpush3.bf16.msra.mxu1 %v1284_v56 }
 0x80b   :  { %1233 = vmatprep.subr.bf16.mxu1 %v1285_v57 }
 0x80e   :  { %1234 = vmatpush3.bf16.msra.mxu1 %v1285_v57 }
 0x80f   :  { %1235 = vmatprep.subr.bf16.mxu1 %v1286_v58 }
 0x812   :  { %1236 = vmatpush3.bf16.msra.mxu1 %v1286_v58 }
 0x813   :  { %1237 = vmatprep.subr.bf16.mxu1 %v1287_v59 }
 0x816   :  { %1238 = vmatpush3.bf16.msra.mxu1 %v1287_v59 }
 0x817   :  { %1239 = vmatprep.subr.bf16.mxu1 %v1288_v60 }
 0x81a   :  { %1240 = vmatpush3.bf16.msra.mxu1 %v1288_v60 }
 0x81b   :  { %1241 = vmatprep.subr.bf16.mxu1 %v1289_v61 }
 0x81e   :  { %1242 = vmatpush3.bf16.msra.mxu1 %v1289_v61 }
 0x81f   :  { %1243 = vmatprep.subr.bf16.mxu1 %v1290_v62 }
 0x822   :  { %1244 = vmatpush3.bf16.msra.mxu1 %v1290_v62 }
 0x8d8   :  { %v1227_v0 = vpop.f32.mrb[12].mxu1 }
 0x8d9   :  { %v836_v63 = vadd.f32 %v1227_v0, %v789_v52  ;;  %v827_v2 = vpop.f32.mrb[13].mxu1 }
 0x8da   :  { %v828_v3 = vadd.f32 %v827_v2, %v787_v49  ;;  %v1228_v4 = vpop.f32.mrb[14].mxu1 }
 0x8db   :  { %v839_v5 = vadd.f32 %v1228_v4, %v790_v50  ;;  %v830_v6 = vpop.f32.mrb[15].mxu1  ;;  %v844_v8 = vmul.f32 %v1538_v20, %v836_v63 }
 0x8dc   :  { %v831_v7 = vadd.f32 %v830_v6, %v788_v51  ;;  %v842_v10 = vmul.f32 %v1540_v25, %v828_v3 }
 0x8dd   :  { %v845_v9 = vmul.f32 %v1542_v26, %v839_v5 }
 0x8de   :  { %v843_v11 = vmul.f32 %v1544_v27, %v831_v7 }
 0x8df   :  { %v864_v12 = vpack.c.bf16 %v845_v9, %v844_v8 }
 0x8e0   :  { %v863_v13 = vpack.c.bf16 %v843_v11, %v842_v10 }
 0x8e2   :  { %1245 = vmatprep.mubr.bf16.mxu1 %v863_v13 }
 0x8e3   :  { %1246 = vmatmul.mubr.bf16.vlgmr.msra.gmra.mrb[16].mxu1 %v864_v12 }
 0x9b6   :  { %v1247_v14 = vpop.f32.mrb[16].mxu1 }
 0x9b7   :  { %v947_v15 = vpop.f32.mrb[17].mxu1  ;;  %v964_v16 = vmax.f32 %v1247_v14, 0.0 }
 0x9b8   :  { %v1248_v1 = vpop.f32.mrb[18].mxu1  ;;  %v962_v19 = vmax.f32 %v947_v15, 0.0 }
 0x9b9   :  { %v965_v17 = vmax.f32 %v1248_v1, 0.0  ;;  %v950_v18 = vpop.f32.mrb[19].mxu1 }
 0x9ba   :  { %v963_v21 = vmax.f32 %v950_v18, 0.0 }
 0x9bb   :  { %v973_v22 = vadd.f32 %v965_v17, %v964_v16 }
 0x9bc   :  { %v966_v20 = vadd.f32 %v963_v21, %v962_v19 }
 0x9bd   :  { %v974_v23 = vrot.slane %v973_v22, 4 }
 0x9be   :  { %v967_v26 = vrot.slane %v966_v20, 4 }
 0x9bf   :  { %v975_v24 = vadd.f32 %v974_v23, %v973_v22 }
 0x9c0   :  { %v968_v25 = vadd.f32 %v967_v26, %v966_v20 }
 0x9c1   :  { %v976_v28 = vrot.slane %v975_v24, 2 }
 0x9c2   :  { %v969_v27 = vrot.slane %v968_v25, 2 }
 0x9c3   :  { %v977_v29 = vadd.f32 %v976_v28, %v975_v24 }
 0x9c4   :  { %v970_v30 = vadd.f32 %v969_v27, %v968_v25 }
 0x9c5   :  { %v978_v31 = vrot.slane %v977_v29, 1 }
 0x9c6   :  { %v971_v32 = vrot.slane %v970_v30, 1 }
 0x9c7   :  { %v979_v33 = vadd.f32 %v978_v31, %v977_v29 }
 0x9c8   :  { %v972_v34 = vadd.f32 %v971_v32, %v970_v30 }
 0x9c9   :  { %v981_v35 = vmul.f32 0.0625, %v979_v33 }
 0x9ca   :  { %v980_v36 = vmul.f32 0.0625, %v972_v34 }
 0x9cc   :  { %v985_v37 = vsel %vm984_vm3, %v981_v35, %v980_v36 }
 0x9cd   :  { %987 = vst [vmem:[#allocation10] sm:$0x3] %v985_v37 }
 0x9ce   :  { %1400 = shalt.err (!%p1397_p8)
}
 0x9cf   :  { %s1401_s13 = scalar_lea.hbm %s1618_s4, 32 }
 0x9d0   :  { %p1402_p9 = scmp.ne.s32.totalorder %s1618_s4, %s1401_s13  ;;  %p1405_p10 = scmp.lt.u32.totalorder %s1401_s13, %s1618_s4 }
 0x9d2   :  { %p1407_p11 = pnand %p1405_p10, %p1402_p9 }
 0x9d4   :  { %1410 = shalt.err (!%p1407_p11)
}
 0x9d5   :  { %997 = dma.vmem_to_hbm [thread:$0]  %s995_s27, 32, %s1618_s4, [#allocation4]  }
 0x9d6   :  { %1417 = dma.done.wait [#allocation4], 32  }
 0x9d7   :  { %1418 = vsyncadd [#allocation4], 4294967264 }
 0x9d8   :  { %1001 = vsyncpa [#allocation3], 1 }
 0x9d9   :  { %1002 = vsyncpa [#allocation6], 1 }
 0x9da   :  { %1003 = vsyncpa [#allocation9], 1 }
 0x9db   :  { %1004 = vsyncpa [#allocation4], 1 }

</bundles_post_ra>
